<compile_context>
chip_gen: v5e
topology: v5e:2x2
jax: 0.10.0
libtpu: 0.0.40
codegen_flags: <defaults>
</compile_context>

<pallas_src>
import jax
import jax.numpy as jnp
from jax.experimental import pallas as pl
from jax.experimental.pallas import tpu as pltpu


def _td_matmul_kernel(x_ref, w_ref, b_ref, o_ref):
    # x_ref: (tm, D_in), w_ref: (D_in, tn), b_ref: (1, tn), o_ref: (tm, tn)
    acc = jnp.dot(x_ref[...], w_ref[...], preferred_element_type=jnp.float32)
    o_ref[...] = (acc + b_ref[...].astype(jnp.float32)).astype(o_ref.dtype)


def time_distributed_linear(x, w, b, *, tm=None, io_dtype=None,
                            stream_buffers=2, vmem_cap_bytes=None):
    """y[:, t, :] = x[:, t, :] @ w + b for every time step t (shared weights).

    tm:             M-tile rows; None = auto (largest VMEM-fitting, <=1024).
    io_dtype:       optional compute dtype for x/w (e.g. jnp.bfloat16); the
                    accumulation stays f32 and the output keeps x's dtype.
    stream_buffers: pipeline depth for the streamed x tiles (sweep 2 vs 3).
    vmem_cap_bytes: override the detected VMEM capacity (testing / tuning).
    """
    B, T, D_in = x.shape
    D_in_w, D_out = w.shape
    assert D_in == D_in_w, "weight shape does not match input features"
    out_dtype = x.dtype

    if io_dtype is not None:
        x = x.astype(io_dtype)
        w = w.astype(io_dtype)
    b2 = b.reshape(1, D_out)  # bias kept in its original (f32) dtype

    # Fuse batch and time into one M axis (free contiguous reshape).
    M = B * T
    x2 = x.reshape(M, D_in)

    # ---------------- per-generation VMEM budgeting ----------------
    real_cap = 64 * 1024 * 1024  # conservative fallback (v7x per-TC floor)
    try:
        cap = getattr(pltpu.get_tpu_info(), "vmem_capacity_bytes", None)
        if cap:
            real_cap = int(cap)
    except Exception:
        pass
    budget_cap = real_cap if vmem_cap_bytes is None else int(vmem_cap_bytes)
    # 20% headroom: ~51 MiB on v7x (64 MiB), ~102 MiB on v5e/v6e (128 MiB).
    budget = int(0.80 * budget_cap)

    isz_x = jnp.dtype(x2.dtype).itemsize
    isz_w = jnp.dtype(w.dtype).itemsize
    isz_b = jnp.dtype(b2.dtype).itemsize
    isz_o = jnp.dtype(out_dtype).itemsize
    x_bufs = max(2, int(stream_buffers))

    def vmem_est(tm_, tn_, w_bufs_):
        return (x_bufs * tm_ * D_in * isz_x          # streamed x tiles
                + 2 * tm_ * tn_ * isz_o              # double-buffered out tiles
                + w_bufs_ * (D_in * tn_ * isz_w + tn_ * isz_b))  # weight + bias

    tm_floor = M if M <= 256 else 256  # minimal sensible M tile for the decision

    # -------- weight residency / N (D_out) tiling decision --------
    if vmem_est(tm_floor, D_out, 2) <= budget:
        tn, w_bufs = D_out, 2                     # fully resident, default buffering
    elif vmem_est(tm_floor, D_out, 1) <= budget:
        tn, w_bufs = D_out, 1                     # resident, single-buffered (constant block)
    else:
        w_bufs = 2
        tn = None
        cand = (D_out // 128) * 128               # lane-aligned weight column tiles
        while cand >= 128:
            if vmem_est(tm_floor, cand, 2) <= budget:
                tn = cand
                break
            cand -= 128
        if tn is None:
            # TODO(synk): add a K (D_in) grid axis with an f32 VMEM accumulator
            # if even a 128-wide weight column block exceeds the VMEM budget.
            tn = 128 if D_out >= 128 else D_out
    grid_n = pl.cdiv(D_out, tn)

    # ---------------------- M tile selection ----------------------
    tm_sel = 1024 if tm is None else int(tm)
    tm_sel = min(tm_sel, M)
    if tm_sel < M:
        tm_sel = max(8, (tm_sel // 8) * 8)        # (8,128) block rule for partial dims
    while tm_sel > 8 and vmem_est(tm_sel, tn, w_bufs) > budget:
        tm_sel = max(8, ((tm_sel // 2) // 8) * 8)
    grid_m = pl.cdiv(M, tm_sel)
    # Keep >= 2 grid points so v7x's two TensorCores both get work.
    if grid_n == 1 and grid_m == 1 and M >= 16:
        tm_sel = max(8, (pl.cdiv(M, 2) // 8) * 8)
        grid_m = pl.cdiv(M, tm_sel)

    # -------------------- specs / compiler params --------------------
    w_pipe = pl.Buffered(1) if w_bufs == 1 else None
    x_pipe = pl.Buffered(int(stream_buffers)) if int(stream_buffers) != 2 else None

    def _spec(shape, index_map, pipe=None):
        if pipe is None:
            return pl.BlockSpec(shape, index_map)
        return pl.BlockSpec(shape, index_map, pipeline_mode=pipe)

    cost = pl.CostEstimate(
        flops=2 * M * D_in * D_out,
        transcendentals=0,
        bytes_accessed=(M * D_in * isz_x + D_in * D_out * isz_w
                        + D_out * isz_b + M * D_out * isz_o),
    )
    est = vmem_est(tm_sel, tn, w_bufs)
    vmem_limit = min(int(0.85 * real_cap), max(2 * est + (4 << 20), 32 << 20))

    if grid_n == 1:
        # Weight-resident regime: 1D grid over M tiles.
        grid = (grid_m,)
        in_specs = [
            _spec((tm_sel, D_in), lambda i: (i, 0), x_pipe),
            _spec((D_in, D_out), lambda i: (0, 0), w_pipe),
            _spec((1, D_out), lambda i: (0, 0), w_pipe),
        ]
        out_specs = pl.BlockSpec((tm_sel, D_out), lambda i: (i, 0))
        dims = ("parallel",)
    else:
        # N (weight-column) axis OUTERMOST: each weight tile is DMA'd once and
        # stays VMEM-resident across the whole inner sweep over M tiles.
        grid = (grid_n, grid_m)
        in_specs = [
            _spec((tm_sel, D_in), lambda j, i: (i, 0), x_pipe),
            pl.BlockSpec((D_in, tn), lambda j, i: (0, j)),
            pl.BlockSpec((1, tn), lambda j, i: (0, j)),
        ]
        out_specs = pl.BlockSpec((tm_sel, tn), lambda j, i: (i, j))
        dims = ("parallel", "parallel")

    out2 = pl.pallas_call(
        _td_matmul_kernel,
        out_shape=jax.ShapeDtypeStruct((M, D_out), out_dtype),
        grid_spec=pltpu.PrefetchScalarGridSpec(
            num_scalar_prefetch=0,
            grid=grid,
            in_specs=in_specs,
            out_specs=out_specs,
        ),
        compiler_params=pltpu.CompilerParams(
            dimension_semantics=dims,
            vmem_limit_bytes=vmem_limit,
        ),
        cost_estimate=cost,
    )(x2, w, b2)

    return out2.reshape(B, T, D_out)


if __name__ == "__main__":
    key = jax.random.PRNGKey(0)
    kx, kw, kb, kx2, kw2, kb2 = jax.random.split(key, 6)

    # ---- 1) weight-resident fused-M path (f32, matches the PyTorch module) ----
    B, T, D_in, D_out = 64, 8, 128, 128
    x = jax.random.normal(kx, (B, T, D_in), dtype=jnp.float32)
    w = jax.random.normal(kw, (D_in, D_out), dtype=jnp.float32) * 0.02
    b = jax.random.normal(kb, (D_out,), dtype=jnp.float32) * 0.01

    y = jax.block_until_ready(time_distributed_linear(x, w, b))
    # Pure-JAX reference mirroring TimeDistributed (split / squeeze / shared Linear / stack).
    y_ref = jnp.stack([x[:, t, :] @ w + b for t in range(T)], axis=1)
    assert y.shape == (B, T, D_out)
    assert jnp.allclose(y, y_ref, atol=1e-4, rtol=1e-4), "mismatch vs reference"

    # ---- 2) forced-tiny-VMEM budget: exercises the N (D_out) tiling fallback ----
    B2, T2, D_in2, D_out2 = 8, 4, 256, 512
    x_b = jax.random.normal(kx2, (B2, T2, D_in2), dtype=jnp.float32)
    w_b = jax.random.normal(kw2, (D_in2, D_out2), dtype=jnp.float32) * 0.02
    b_b = jax.random.normal(kb2, (D_out2,), dtype=jnp.float32) * 0.01
    y_b = jax.block_until_ready(
        time_distributed_linear(x_b, w_b, b_b, vmem_cap_bytes=512 * 1024))
    y_b_ref = jnp.stack([x_b[:, t, :] @ w_b + b_b for t in range(T2)], axis=1)
    assert jnp.allclose(y_b, y_b_ref, atol=2e-4, rtol=2e-4), "mismatch (N-tiled path)"

    # ---- 3) bf16 I/O path (f32 accumulation; memory-bound win on v6e/v7x) ----
    y_bf = jax.block_until_ready(time_distributed_linear(x, w, b, io_dtype=jnp.bfloat16))
    assert y_bf.dtype == jnp.float32
    assert jnp.allclose(y_bf, y_ref, atol=3e-2, rtol=3e-2), "mismatch (bf16 path)"

    print("KERNEL_OK")
</pallas_src>

<mosaic_0001>
module attributes {stable_mosaic.version = 11 : i64} {
  func.func @_td_matmul_kernel(%arg0: i32, %arg1: memref<256x128xf32, #tpu.memory_space<vmem>>, %arg2: memref<128x128xf32, #tpu.memory_space<vmem>>, %arg3: memref<1x128xf32, #tpu.memory_space<vmem>>, %arg4: memref<256x128xf32, #tpu.memory_space<vmem>>) attributes {dimension_semantics = [#tpu.dimension_semantics<parallel>], iteration_bounds = array<i64: 2>, scalar_prefetch = 0 : i64, scratch_operands = 0 : i64, tpu.core_type = #tpu.core_type<tc>, window_params = [{transform_indices = @transform_0, window_bounds = array<i64: 256, 128>}, {pipeline_mode = #tpu.pipeline_mode<synchronous>, transform_indices = @transform_1, window_bounds = array<i64: 128, 128>}, {pipeline_mode = #tpu.pipeline_mode<synchronous>, transform_indices = @transform_2, window_bounds = array<i64: 1, 128>}, {transform_indices = @transform_3, window_bounds = array<i64: 256, 128>}]} {
    %c0 = arith.constant 0 : index
    %c0_0 = arith.constant 0 : index
    %0 = vector.load %arg1[%c0, %c0_0] : memref<256x128xf32, #tpu.memory_space<vmem>>, vector<256x128xf32>
    %c0_1 = arith.constant 0 : index
    %c0_2 = arith.constant 0 : index
    %1 = vector.load %arg2[%c0_1, %c0_2] : memref<128x128xf32, #tpu.memory_space<vmem>>, vector<128x128xf32>
    %cst = arith.constant dense<0.000000e+00> : vector<256x128xf32>
    %2 = tpu.matmul %0, %1, %cst {dimension_numbers = #tpu.dot_dimension_numbers<[1], [0], [0], [1], [0, 0, 1, 1], [], []>} : vector<256x128xf32>, vector<128x128xf32>, vector<256x128xf32> -> vector<256x128xf32>
    %c0_3 = arith.constant 0 : index
    %c0_4 = arith.constant 0 : index
    %3 = vector.load %arg3[%c0_3, %c0_4] : memref<1x128xf32, #tpu.memory_space<vmem>>, vector<1x128xf32>
    %4 = vector.broadcast %3 : vector<1x128xf32> to vector<256x128xf32>
    %5 = arith.addf %2, %4 : vector<256x128xf32>
    %c0_5 = arith.constant 0 : index
    %c0_6 = arith.constant 0 : index
    %6 = vector.load %arg4[%c0_5, %c0_6] : memref<256x128xf32, #tpu.memory_space<vmem>>, vector<256x128xf32>
    tpu.vector_store %arg4[%c0_5, %c0_6], %5 {strides = array<i32>} : memref<256x128xf32, #tpu.memory_space<vmem>>, vector<256x128xf32>,
    return
  }
  func.func @transform_0(%arg0: i32) -> (i32, i32) {
    %c0_i32 = arith.constant 0 : i32
    %c0_i32_0 = arith.constant 0 : i32
    return %arg0, %c0_i32 : i32, i32
  }
  func.func @transform_1(%arg0: i32) -> (i32, i32) {
    %c0_i32 = arith.constant 0 : i32
    %c0_i32_0 = arith.constant 0 : i32
    %c0_i32_1 = arith.constant 0 : i32
    return %c0_i32, %c0_i32_0 : i32, i32
  }
  func.func @transform_2(%arg0: i32) -> (i32, i32) {
    %c0_i32 = arith.constant 0 : i32
    %c0_i32_0 = arith.constant 0 : i32
    %c0_i32_1 = arith.constant 0 : i32
    return %c0_i32, %c0_i32_0 : i32, i32
  }
  func.func @transform_3(%arg0: i32) -> (i32, i32) {
    %c0_i32 = arith.constant 0 : i32
    %c0_i32_0 = arith.constant 0 : i32
    return %arg0, %c0_i32 : i32, i32
  }
}

</mosaic_0001>

<bundles_post_ra>
// kernel: tpu_custom_call.1
= control target key start
LH: loop header
LB: loop body
LE: loop exit
PB: predicated region body
PF: predicated region fallthrough
CT: control target
= control target key end

     0   :  { %8 = vsyncpa [#allocation3], 0  ;;  %s1045_s0 = inlined_call_operand.hbm [shape: f32[512,128], index: 0, kind: input, shape index: {}]   ;;  %s1046_s1 = inlined_call_operand.hbm [shape: f32[128,128], index: 1, kind: input, shape index: {}]   ;;  %s1047_s2 = inlined_call_operand.vmem [shape: f32[1,128], index: 2, kind: input, shape index: {}]   ;;  %s1048_s3 = inlined_call_operand.hbm [shape: f32[512,128], index: 3, kind: output, shape index: {}]  }
   0x1   :  { %10 = vsyncpa [#allocation3 + $0x1], 0 }
   0x2   :  { %11 = vsyncpa [#allocation6], 0 }
   0x3   :  { %12 = vsyncpa [#allocation4], 0 }
   0x4   :  { %14 = vsyncpa [#allocation4 + $0x1], 0  ;;  %s791_s12 = smov 0   ;;  %s793_s13 = smov 0  }
   0x5   :  { %s795_s14 = smov 0   ;;  %s797_s15 = smov 0  }
   0x6 LB: > { %s812_s16 = sadd.s32 4294967295, %s764_s15   ;;  %s506_s17 = sadd.s32 4294967294, %s764_s15   ;;  %s764_s15 = sphi %s797_s15, %s1058_s15   ;;  %s760_s14 = sphi %s795_s14, %s1057_s14   ;;  %s756_s13 = sphi %s793_s13, %s1056_s13   ;;  %s752_s12 = sphi %s791_s12, %s1055_s12  }
   0x7   : > { %p40_p0 = scmp.ne.s32.totalorder %s756_s13, %s752_s12  ;;  %p41_p1 = scmp.eq.s32.totalorder %s812_s16, 0 }
   0x8   : > { %p106_p2 = scmp.eq.s32.totalorder %s812_s16, 1  ;;  %p112_p3 = scmp.eq.s32.totalorder %s506_s17, 1 }
   0x9   : > { %p821_p4 = por %p41_p1, %p40_p0  ;;  %p507_p5 = scmp.ge.s32.totalorder %s764_s15, 1 }
   0xa   : > { %p826_p6 = por %p112_p3, %p40_p0  ;;  %p119_p7 = scmp.lt.s32.totalorder %s764_s15, 3 }
   0xb   : > { %s130_s22 = sshll.u32 %s1046_s1, 4  ;;  %s766_s24 = smov [#allocation5]   ;;  %s131_s22 = int_to_ptr.hbm [resolvable:$true] %s130_s22 }
   0xc   : > { %p834_p8 = pnand %p507_p5, %p119_p7  ;;  %s132_s25 = sshll.u32 %s766_s24, 4  ;;  %s133_s25 = int_to_ptr.vmem [resolvable:$true] %s132_s25 }
   0xd   : > { %s844_s26 = sadd.s32 1, %s764_s15   ;;  %s767_s27 = smov 128  }
   0xe   : > { %p580_p9 = pneg %p834_p8  ;;  %s768_s28 = smov 8  }
   0xf   : > { %s24_s29 = ssub.s32 %s764_s15, %s844_s26  ;;  %s27_s30 = sadd.s32 1, %s760_s14 }
  0x10   : > { %p581_p10 = pnand %p580_p9, %p41_p1  ;;  %p25_p12 = scmp.eq.s32.totalorder %s24_s29, 0 }
  0x11   : > { %p34_p13 = scmp.ne.s32.totalorder %s760_s14, %s756_s13  ;;  %p35_p0 = scmp.eq.s32.totalorder %s764_s15, 0 }
  0x12   : > { %583 = dma.hbm_to_vmem [thread:$0]  (!%p581_p10), %s131_s22, 2048, %s133_s25, [#allocation6], %s767_s27, %s767_s27, %s768_s28  }
  0x13   : > { %s856_s4 = scalar_select %p25_p12, %s760_s14, %s27_s30  }
  0x14   : > { %p860_p3 = por %p106_p2, %p34_p13  ;;  %p593_p5 = scmp.lt.s32.totalorder %s764_s15, 2 }
  0x15   : > { %s149_s6 = sand.u32 1, %s760_s14   ;;  %s522_s7 = sshll.u32 %s764_s15, 8 }
  0x16   : > { %p36_p7 = por %p35_p0, %p34_p13  ;;  %s510_s8 = sshll.u32 %s149_s6, 8 }
  0x17   : > { %s158_s11 = scalar_lea.hbm %s1045_s0, %s522_s7  ;;  %s153_s20 = scalar_lea.vmem [#allocation2], %s510_s8 }
  0x18   : > { %s159_s17 = sshll.u32 %s158_s11, 4  ;;  %s161_s21 = sshll.u32 %s153_s20, 4  ;;  %s160_s17 = int_to_ptr.hbm [resolvable:$true] %s159_s17  ;;  %s162_s21 = int_to_ptr.vmem [resolvable:$true] %s161_s21 }
  0x19   : > { %p870_p9 = pnand %p593_p5, %p36_p7  ;;  %s150_s24 = scalar_lea.sflag [#allocation3], %s149_s6 }
  0x1a   : > { %s664_s25 = sshra.s32 %s160_s17, 4  ;;  %s671_s8 = scalar_lea.hbm %s1045_s0, 512  ;;  %s665_s25 = int_to_ptr.hbm [resolvable:$true] %s664_s25 }
  0x1b   : > { %s666_s29 = scalar_lea.hbm %s665_s25, 256  ;;  %p668_p10 = pneg %p870_p9 }
  0x1c   : > { %p667_p2 = scmp.ne.s32.totalorder %s665_s25, %s666_s29  ;;  %p672_p0 = scmp.lt.s32.totalorder %s665_s25, %s1045_s0 }
  0x1d   : > { %p673_p5 = scmp.lt.s32.totalorder %s671_s8, %s666_s29 }
  0x1e   : > { %p669_p12 = pnand %p668_p10, %p667_p2 }
  0x1f   : > { %p674_p7 = por %p673_p5, %p672_p0 }
  0x20   : > { %p670_p13 = pneg %p669_p12 }
  0x22   : > { %p675_p11 = pnand %p674_p7, %p670_p13 }
  0x24   : > { %678 = shalt.err (!%p675_p11)
}
  0x25   : > { %587 = dma.hbm_to_vmem [thread:$0]  (!%p870_p9), %s160_s17, 4096, %s162_s21, %s150_s24, %s767_s27, %s767_s27, %s768_s28  }
  0x26   : > { %173 = sbr.rel (%p834_p8) target bundleno = 273 (0x111), region = 32  ;;  %s890_s6 = sand.u32 (!%p834_p8), 1, %s756_s13  }
  0x27   : > { %s514_s11 = sshll.u32 (!%p834_p8), %s890_s6, 8  ;;  %s176_s20 = scalar_lea.sflag (!%p834_p8), [#allocation3], %s890_s6 }
  0x28   : > { %s896_s25 = scalar_lea.vmem (!%p834_p8), [#allocation2], %s514_s11 }
  0x2b   : > { %739 = dma.done.wait (%p821_p4), %s176_s20, 4096  }
  0x2c   : > { %741 = vsyncadd (%p821_p4), %s176_s20, 4294963200 }
  0x2d   : > { %743 = dma.done.wait (%p41_p1), [#allocation6], 2048  }
  0x2e   : > { %745 = vsyncadd (%p41_p1), [#allocation6], 4294965248  ;;  %v257_v0 = vld [vmem:[#allocation5 + $0x78] sm:$0xff]  ;;  %v256_v1 = vld [vmem:[#allocation5 + $0x70] sm:$0xff]  ;;  %s947_s27 = scalar_lea.vmem [#allocation7], %s514_s11  ;;  %s523_s28 = sshll.u32 %s812_s16, 8 }
  0x2f   : > { %525 = vmatpush.msra.mxu2 %v257_v0  ;;  %526 = vmatpush.msra.mxu3 %v257_v0  ;;  %v255_v2 = vld [vmem:[#allocation5 + $0x68] sm:$0xff]  ;;  %v254_v3 = vld [vmem:[#allocation5 + $0x60] sm:$0xff]  ;;  %v253_v4 = vld [vmem:[#allocation5 + $0x58] sm:$0xff]  ;;  %s419_s22 = scalar_lea.hbm %s1048_s3, %s523_s28  ;;  %s420_s16 = sshll.u32 %s947_s27, 4  ;;  %s421_s16 = int_to_ptr.vmem [resolvable:$true] %s420_s16 }
  0x30   : > { %262 = vmatpush.msra.mxu0 %v257_v0  ;;  %524 = vmatpush.msra.mxu1 %v257_v0  ;;  %v252_v5 = vld [vmem:[#allocation5 + $0x50] sm:$0xff]  ;;  %v251_v6 = vld [vmem:[#allocation5 + $0x48] sm:$0xff]  ;;  %v250_v7 = vld [vmem:[#allocation5 + $0x40] sm:$0xff]  ;;  %s422_s24 = sshll.u32 %s419_s22, 4  ;;  %s408_s29 = scalar_lea.sflag [#allocation4], %s890_s6  ;;  %s423_s24 = int_to_ptr.hbm [resolvable:$true] %s422_s24 }
  0x31   : > { %528 = vmatpush.msra.mxu2 %v256_v1  ;;  %529 = vmatpush.msra.mxu3 %v256_v1  ;;  %v249_v8 = vld [vmem:[#allocation5 + $0x38] sm:$0xff]  ;;  %v248_v9 = vld [vmem:[#allocation5 + $0x30] sm:$0xff]  ;;  %v247_v10 = vld [vmem:[#allocation5 + $0x28] sm:$0xff]  ;;  %s708_s30 = sshra.s32 %s423_s24, 4  ;;  %s714_s10 = scalar_lea.hbm %s1048_s3, 512  ;;  %s709_s30 = int_to_ptr.hbm [resolvable:$true] %s708_s30 }
  0x32   : > { %263 = vmatpush.msra.mxu0 %v256_v1  ;;  %527 = vmatpush.msra.mxu1 %v256_v1  ;;  %v246_v11 = vld [vmem:[#allocation5 + $0x20] sm:$0xff]  ;;  %v245_v12 = vld [vmem:[#allocation5 + $0x18] sm:$0xff]  ;;  %v244_v13 = vld [vmem:[#allocation5 + $0x10] sm:$0xff]  ;;  %s710_s7 = scalar_lea.hbm %s709_s30, 256  ;;  %p715_p11 = scmp.lt.s32.totalorder %s709_s30, %s1048_s3 }
  0x33   : > { %531 = vmatpush.msra.mxu2 %v255_v2  ;;  %532 = vmatpush.msra.mxu3 %v255_v2  ;;  %v243_v14 = vld [vmem:[#allocation5 + $0x8] sm:$0xff]  ;;  %v242_v15 = vld [vmem:[#allocation5] sm:$0xff]  ;;  %v228_v24 = vld [vmem:[%s896_s25 + $0x90] sm:$0xff]  ;;  %p711_p1 = scmp.ne.s32.totalorder %s709_s30, %s710_s7  ;;  %p716_p9 = scmp.lt.s32.totalorder %s714_s10, %s710_s7 }
  0x34   : > { %264 = vmatpush.msra.mxu0 %v255_v2  ;;  %530 = vmatpush.msra.mxu1 %v255_v2  ;;  %v226_v16 = vld [vmem:[%s896_s25 + $0x80] sm:$0xff]  ;;  %v227_v20 = vld [vmem:[%s896_s25 + $0x88] sm:$0xff]  ;;  %v236_v25 = vld [vmem:[%s896_s25 + $0xd0] sm:$0xff] }
  0x35   : > { %534 = vmatpush.msra.mxu2 %v254_v3  ;;  %535 = vmatpush.msra.mxu3 %v254_v3  ;;  %v234_v17 = vld [vmem:[%s896_s25 + $0xc0] sm:$0xff]  ;;  %v235_v21 = vld [vmem:[%s896_s25 + $0xc8] sm:$0xff]  ;;  %v212_v26 = vld [vmem:[%s896_s25 + $0x10] sm:$0xff]  ;;  %p712_p4 = pnand %p711_p1, %p860_p3  ;;  %p717_p2 = por %p716_p9, %p715_p11 }
  0x36   : > { %265 = vmatpush.msra.mxu0 %v254_v3  ;;  %533 = vmatpush.msra.mxu1 %v254_v3  ;;  %v210_v18 = vld [vmem:[%s896_s25] sm:$0xff]  ;;  %v211_v22 = vld [vmem:[%s896_s25 + $0x8] sm:$0xff]  ;;  %v220_v27 = vld [vmem:[%s896_s25 + $0x50] sm:$0xff] }
  0x37   : > { %537 = vmatpush.msra.mxu2 %v253_v4  ;;  %538 = vmatpush.msra.mxu3 %v253_v4  ;;  %v218_v19 = vld [vmem:[%s896_s25 + $0x40] sm:$0xff]  ;;  %v219_v23 = vld [vmem:[%s896_s25 + $0x48] sm:$0xff]  ;;  %v229_v28 = vld [vmem:[%s896_s25 + $0x98] sm:$0xff]  ;;  %p713_p8 = pneg %p712_p4 }
  0x38   : > { %266 = vmatpush.msra.mxu0 %v253_v4  ;;  %536 = vmatpush.msra.mxu1 %v253_v4  ;;  %v237_v29 = vld [vmem:[%s896_s25 + $0xd8] sm:$0xff]  ;;  %v230_v32 = vld [vmem:[%s896_s25 + $0xa0] sm:$0xff]  ;;  %v231_v36 = vld [vmem:[%s896_s25 + $0xa8] sm:$0xff] }
  0x39   : > { %540 = vmatpush.msra.mxu2 %v252_v5  ;;  %541 = vmatpush.msra.mxu3 %v252_v5  ;;  %v213_v30 = vld [vmem:[%s896_s25 + $0x18] sm:$0xff]  ;;  %v238_v33 = vld [vmem:[%s896_s25 + $0xe0] sm:$0xff]  ;;  %v239_v37 = vld [vmem:[%s896_s25 + $0xe8] sm:$0xff]  ;;  %p718_p10 = pnand %p717_p2, %p713_p8 }
  0x3a   : > { %267 = vmatpush.msra.mxu0 %v252_v5  ;;  %539 = vmatpush.msra.mxu1 %v252_v5  ;;  %v221_v31 = vld [vmem:[%s896_s25 + $0x58] sm:$0xff]  ;;  %v214_v34 = vld [vmem:[%s896_s25 + $0x20] sm:$0xff]  ;;  %v215_v38 = vld [vmem:[%s896_s25 + $0x28] sm:$0xff] }
  0x3b   : > { %543 = vmatpush.msra.mxu2 %v251_v6  ;;  %544 = vmatpush.msra.mxu3 %v251_v6  ;;  %v222_v35 = vld [vmem:[%s896_s25 + $0x60] sm:$0xff]  ;;  %v223_v39 = vld [vmem:[%s896_s25 + $0x68] sm:$0xff]  ;;  %v232_v40 = vld [vmem:[%s896_s25 + $0xb0] sm:$0xff] }
  0x3c   : > { %268 = vmatpush.msra.mxu0 %v251_v6  ;;  %542 = vmatpush.msra.mxu1 %v251_v6  ;;  %v240_v41 = vld [vmem:[%s896_s25 + $0xf0] sm:$0xff]  ;;  %v233_v44 = vld [vmem:[%s896_s25 + $0xb8] sm:$0xff]  ;;  %v941_v48 = vld [vmem:[%s1047_s2] ss:$0 sm:$0xff] }
  0x3d   : > { %546 = vmatpush.msra.mxu2 %v250_v7  ;;  %547 = vmatpush.msra.mxu3 %v250_v7  ;;  %v216_v42 = vld [vmem:[%s896_s25 + $0x30] sm:$0xff]  ;;  %v241_v45 = vld [vmem:[%s896_s25 + $0xf8] sm:$0xff] }
  0x3e   : > { %269 = vmatpush.msra.mxu0 %v250_v7  ;;  %545 = vmatpush.msra.mxu1 %v250_v7  ;;  %v224_v43 = vld [vmem:[%s896_s25 + $0x70] sm:$0xff]  ;;  %v217_v46 = vld [vmem:[%s896_s25 + $0x38] sm:$0xff] }
  0x3f   : > { %549 = vmatpush.msra.mxu2 %v249_v8  ;;  %550 = vmatpush.msra.mxu3 %v249_v8  ;;  %v225_v47 = vld [vmem:[%s896_s25 + $0x78] sm:$0xff] }
  0x40   : > { %270 = vmatpush.msra.mxu0 %v249_v8  ;;  %548 = vmatpush.msra.mxu1 %v249_v8 }
  0x41   : > { %552 = vmatpush.msra.mxu2 %v248_v9  ;;  %553 = vmatpush.msra.mxu3 %v248_v9 }
  0x42   : > { %271 = vmatpush.msra.mxu0 %v248_v9  ;;  %551 = vmatpush.msra.mxu1 %v248_v9 }
  0x43   : > { %555 = vmatpush.msra.mxu2 %v247_v10  ;;  %556 = vmatpush.msra.mxu3 %v247_v10 }
  0x44   : > { %272 = vmatpush.msra.mxu0 %v247_v10  ;;  %554 = vmatpush.msra.mxu1 %v247_v10 }
  0x45   : > { %558 = vmatpush.msra.mxu2 %v246_v11  ;;  %559 = vmatpush.msra.mxu3 %v246_v11 }
  0x46   : > { %273 = vmatpush.msra.mxu0 %v246_v11  ;;  %557 = vmatpush.msra.mxu1 %v246_v11 }
  0x47   : > { %561 = vmatpush.msra.mxu2 %v245_v12  ;;  %562 = vmatpush.msra.mxu3 %v245_v12 }
  0x48   : > { %274 = vmatpush.msra.mxu0 %v245_v12  ;;  %560 = vmatpush.msra.mxu1 %v245_v12 }
  0x49   : > { %564 = vmatpush.msra.mxu2 %v244_v13  ;;  %565 = vmatpush.msra.mxu3 %v244_v13 }
  0x4a   : > { %275 = vmatpush.msra.mxu0 %v244_v13  ;;  %563 = vmatpush.msra.mxu1 %v244_v13 }
  0x4b   : > { %567 = vmatpush.msra.mxu2 %v243_v14  ;;  %568 = vmatpush.msra.mxu3 %v243_v14 }
  0x4c   : > { %276 = vmatpush.msra.mxu0 %v243_v14  ;;  %566 = vmatpush.msra.mxu1 %v243_v14 }
  0x4d   : > { %570 = vmatpush.msra.mxu2 %v242_v15  ;;  %571 = vmatpush.msra.mxu3 %v242_v15 }
  0x4e   : > { %326 = vmatmul.f32.vlgmr.msra.gmra.mxu2 %v226_v16  ;;  %350 = vmatmul.f32.vlgmr.msra.gmra.mxu3 %v234_v17 }
  0x4f   : > { %277 = vmatpush.msra.mxu0 %v242_v15  ;;  %569 = vmatpush.msra.mxu1 %v242_v15 }
  0x50   : > { %278 = vmatmul.f32.vlgmr.msra.gmra.mxu0 %v210_v18  ;;  %302 = vmatmul.f32.vlgmr.msra.gmra.mxu1 %v218_v19 }
  0x56   : > { %329 = vmatmul.f32.gmra.mxu2 %v227_v20  ;;  %353 = vmatmul.f32.gmra.mxu3 %v235_v21 }
  0x58   : > { %281 = vmatmul.f32.gmra.mxu0 %v211_v22  ;;  %305 = vmatmul.f32.gmra.mxu1 %v219_v23 }
  0x5e   : > { %332 = vmatmul.f32.gmra.mxu2 %v228_v24  ;;  %356 = vmatmul.f32.gmra.mxu3 %v236_v25 }
  0x60   : > { %284 = vmatmul.f32.gmra.mxu0 %v212_v26  ;;  %308 = vmatmul.f32.gmra.mxu1 %v220_v27 }
  0x66   : > { %335 = vmatmul.f32.gmra.mxu2 %v229_v28  ;;  %359 = vmatmul.f32.gmra.mxu3 %v237_v29 }
  0x68   : > { %287 = vmatmul.f32.gmra.mxu0 %v213_v30  ;;  %311 = vmatmul.f32.gmra.mxu1 %v221_v31 }
  0x6e   : > { %338 = vmatmul.f32.gmra.mxu2 %v230_v32  ;;  %362 = vmatmul.f32.gmra.mxu3 %v238_v33 }
  0x70   : > { %290 = vmatmul.f32.gmra.mxu0 %v214_v34  ;;  %314 = vmatmul.f32.gmra.mxu1 %v222_v35 }
  0x76   : > { %341 = vmatmul.f32.gmra.mxu2 %v231_v36  ;;  %365 = vmatmul.f32.gmra.mxu3 %v239_v37 }
  0x78   : > { %293 = vmatmul.f32.gmra.mxu0 %v215_v38  ;;  %317 = vmatmul.f32.gmra.mxu1 %v223_v39 }
  0x7e   : > { %344 = vmatmul.f32.gmra.mxu2 %v232_v40  ;;  %368 = vmatmul.f32.gmra.mxu3 %v240_v41 }
  0x80   : > { %296 = vmatmul.f32.gmra.mxu0 %v216_v42  ;;  %320 = vmatmul.f32.gmra.mxu1 %v224_v43 }
  0x86   : > { %347 = vmatmul.f32.gmra.mxu2 %v233_v44  ;;  %371 = vmatmul.f32.gmra.mxu3 %v241_v45 }
  0x88   : > { %299 = vmatmul.f32.gmra.mxu0 %v217_v46  ;;  %323 = vmatmul.f32.gmra.mxu1 %v225_v47 }
  0xcd   : > { %v279_v49 = vpop.f32.mrf.mxu0  ;;  %v303_v50 = vpop.f32.mrf.mxu1 }
  0xce   : > { %v280_v51 = vadd.f32 %v941_v48, %v279_v49  ;;  %v304_v52 = vadd.f32 %v941_v48, %v303_v50 }
  0xd0   : > { %375 = vst [vmem:[%s947_s27] sm:$0xff] %v280_v51 }
  0xd1   : > { %383 = vst [vmem:[%s947_s27 + $0x40] sm:$0xff] %v304_v52  ;;  %v327_v53 = vpop.f32.mrf.mxu2  ;;  %v351_v54 = vpop.f32.mrf.mxu3 }
  0xd2   : > { %v328_v55 = vadd.f32 %v941_v48, %v327_v53  ;;  %v352_v56 = vadd.f32 %v941_v48, %v351_v54 }
  0xd4   : > { %391 = vst [vmem:[%s947_s27 + $0x80] sm:$0xff] %v328_v55 }
  0xd5   : > { %399 = vst [vmem:[%s947_s27 + $0xc0] sm:$0xff] %v352_v56  ;;  %v282_v57 = vpop.f32.mrf.mxu0  ;;  %v306_v58 = vpop.f32.mrf.mxu1 }
  0xd6   : > { %v283_v59 = vadd.f32 %v941_v48, %v282_v57  ;;  %v307_v60 = vadd.f32 %v941_v48, %v306_v58 }
  0xd8   : > { %376 = vst [vmem:[%s947_s27 + $0x8] sm:$0xff] %v283_v59 }
  0xd9   : > { %384 = vst [vmem:[%s947_s27 + $0x48] sm:$0xff] %v307_v60  ;;  %v330_v61 = vpop.f32.mrf.mxu2  ;;  %v354_v62 = vpop.f32.mrf.mxu3 }
  0xda   : > { %v331_v63 = vadd.f32 %v941_v48, %v330_v61  ;;  %v355_v0 = vadd.f32 %v941_v48, %v354_v62 }
  0xdc   : > { %392 = vst [vmem:[%s947_s27 + $0x88] sm:$0xff] %v331_v63 }
  0xdd   : > { %400 = vst [vmem:[%s947_s27 + $0xc8] sm:$0xff] %v355_v0  ;;  %v285_v1 = vpop.f32.mrf.mxu0  ;;  %v309_v2 = vpop.f32.mrf.mxu1 }
  0xde   : > { %v286_v3 = vadd.f32 %v941_v48, %v285_v1  ;;  %v310_v4 = vadd.f32 %v941_v48, %v309_v2 }
  0xe0   : > { %377 = vst [vmem:[%s947_s27 + $0x10] sm:$0xff] %v286_v3 }
  0xe1   : > { %385 = vst [vmem:[%s947_s27 + $0x50] sm:$0xff] %v310_v4  ;;  %v333_v5 = vpop.f32.mrf.mxu2  ;;  %v357_v6 = vpop.f32.mrf.mxu3 }
  0xe2   : > { %v334_v7 = vadd.f32 %v941_v48, %v333_v5  ;;  %v358_v8 = vadd.f32 %v941_v48, %v357_v6 }
  0xe4   : > { %393 = vst [vmem:[%s947_s27 + $0x90] sm:$0xff] %v334_v7 }
  0xe5   : > { %401 = vst [vmem:[%s947_s27 + $0xd0] sm:$0xff] %v358_v8  ;;  %v288_v9 = vpop.f32.mrf.mxu0  ;;  %v312_v10 = vpop.f32.mrf.mxu1 }
  0xe6   : > { %v289_v11 = vadd.f32 %v941_v48, %v288_v9  ;;  %v313_v12 = vadd.f32 %v941_v48, %v312_v10 }
  0xe8   : > { %378 = vst [vmem:[%s947_s27 + $0x18] sm:$0xff] %v289_v11 }
  0xe9   : > { %386 = vst [vmem:[%s947_s27 + $0x58] sm:$0xff] %v313_v12  ;;  %v336_v13 = vpop.f32.mrf.mxu2  ;;  %v360_v14 = vpop.f32.mrf.mxu3 }
  0xea   : > { %v337_v15 = vadd.f32 %v941_v48, %v336_v13  ;;  %v361_v16 = vadd.f32 %v941_v48, %v360_v14 }
  0xec   : > { %394 = vst [vmem:[%s947_s27 + $0x98] sm:$0xff] %v337_v15 }
  0xed   : > { %402 = vst [vmem:[%s947_s27 + $0xd8] sm:$0xff] %v361_v16  ;;  %v291_v17 = vpop.f32.mrf.mxu0  ;;  %v315_v18 = vpop.f32.mrf.mxu1 }
  0xee   : > { %v292_v19 = vadd.f32 %v941_v48, %v291_v17  ;;  %v316_v20 = vadd.f32 %v941_v48, %v315_v18 }
  0xf0   : > { %379 = vst [vmem:[%s947_s27 + $0x20] sm:$0xff] %v292_v19 }
  0xf1   : > { %387 = vst [vmem:[%s947_s27 + $0x60] sm:$0xff] %v316_v20  ;;  %v339_v21 = vpop.f32.mrf.mxu2  ;;  %v363_v22 = vpop.f32.mrf.mxu3 }
  0xf2   : > { %v340_v23 = vadd.f32 %v941_v48, %v339_v21  ;;  %v364_v24 = vadd.f32 %v941_v48, %v363_v22 }
  0xf4   : > { %395 = vst [vmem:[%s947_s27 + $0xa0] sm:$0xff] %v340_v23 }
  0xf5   : > { %403 = vst [vmem:[%s947_s27 + $0xe0] sm:$0xff] %v364_v24  ;;  %v294_v25 = vpop.f32.mrf.mxu0  ;;  %v318_v26 = vpop.f32.mrf.mxu1 }
  0xf6   : > { %v295_v27 = vadd.f32 %v941_v48, %v294_v25  ;;  %v319_v28 = vadd.f32 %v941_v48, %v318_v26 }
  0xf8   : > { %380 = vst [vmem:[%s947_s27 + $0x28] sm:$0xff] %v295_v27 }
  0xf9   : > { %388 = vst [vmem:[%s947_s27 + $0x68] sm:$0xff] %v319_v28  ;;  %v342_v29 = vpop.f32.mrf.mxu2  ;;  %v366_v30 = vpop.f32.mrf.mxu3 }
  0xfa   : > { %v343_v31 = vadd.f32 %v941_v48, %v342_v29  ;;  %v367_v32 = vadd.f32 %v941_v48, %v366_v30 }
  0xfc   : > { %396 = vst [vmem:[%s947_s27 + $0xa8] sm:$0xff] %v343_v31 }
  0xfd   : > { %404 = vst [vmem:[%s947_s27 + $0xe8] sm:$0xff] %v367_v32  ;;  %v297_v33 = vpop.f32.mrf.mxu0  ;;  %v321_v34 = vpop.f32.mrf.mxu1 }
  0xfe   : > { %v298_v35 = vadd.f32 %v941_v48, %v297_v33  ;;  %v322_v36 = vadd.f32 %v941_v48, %v321_v34 }
 0x100   : > { %381 = vst [vmem:[%s947_s27 + $0x30] sm:$0xff] %v298_v35 }
 0x101   : > { %389 = vst [vmem:[%s947_s27 + $0x70] sm:$0xff] %v322_v36  ;;  %v345_v37 = vpop.f32.mrf.mxu2  ;;  %v369_v38 = vpop.f32.mrf.mxu3 }
 0x102   : > { %v346_v39 = vadd.f32 %v941_v48, %v345_v37  ;;  %v370_v40 = vadd.f32 %v941_v48, %v369_v38 }
 0x104   : > { %397 = vst [vmem:[%s947_s27 + $0xb0] sm:$0xff] %v346_v39 }
 0x105   : > { %405 = vst [vmem:[%s947_s27 + $0xf0] sm:$0xff] %v370_v40  ;;  %v300_v41 = vpop.f32.mrf.mxu0  ;;  %v324_v42 = vpop.f32.mrf.mxu1 }
 0x106   : > { %v301_v43 = vadd.f32 %v941_v48, %v300_v41  ;;  %v325_v44 = vadd.f32 %v941_v48, %v324_v42 }
 0x108   : > { %382 = vst [vmem:[%s947_s27 + $0x38] sm:$0xff] %v301_v43 }
 0x109   : > { %390 = vst [vmem:[%s947_s27 + $0x78] sm:$0xff] %v325_v44  ;;  %v348_v45 = vpop.f32.mrf.mxu2  ;;  %v372_v46 = vpop.f32.mrf.mxu3 }
 0x10a   : > { %v349_v47 = vadd.f32 %v941_v48, %v348_v45  ;;  %v373_v49 = vadd.f32 %v941_v48, %v372_v46 }
 0x10c   : > { %398 = vst [vmem:[%s947_s27 + $0xb8] sm:$0xff] %v349_v47 }
 0x10d   : > { %406 = vst [vmem:[%s947_s27 + $0xf8] sm:$0xff] %v373_v49 }
 0x10e   : > { %721 = shalt.err (!%p718_p10)
}
 0x10f   : > { %s769_s6 = smov 128   ;;  %s770_s25 = smov 8  }
 0x110   : > { %578 = dma.vmem_to_hbm [thread:$0]  (%p860_p3), %s421_s16, 4096, %s423_s24, %s408_s29, %s769_s6, %s769_s6, %s770_s25  }
 0x111 PF: > { %s437_s18 = sand.u32 1, %s752_s12   ;;  %p1054_p12 = scmp.ge.s32.totalorder %s764_s15, 2 }
 0x112   : > { %s438_s23 = scalar_lea.sflag [#allocation4], %s437_s18 }
 0x113   : > { %p589_p13 = pnand %p1054_p12, %p826_p6 }
 0x115   : > { %p590_p0 = pneg %p589_p13 }
 0x117   : > { %747 = dma.done.wait (%p590_p0), %s438_s23, 4096  }
 0x118   : > { %749 = vsyncadd (%p590_p0), %s438_s23, 4294963200  ;;  %p17_p5 = scmp.ge.s32.totalorder %s844_s26, 4   ;;  %s1055_s12 = smov %s756_s13 }
 0x119   : > { %s1056_s13 = smov %s760_s14  ;;  %s1057_s14 = smov %s856_s4 }
 0x11a   : > { %s1058_s15 = smov %s844_s26  ;;  %19 = sbr.rel (!%p17_p5) target bundleno = 6 (0x6), region = 81 }
 0x11f   :  { %444 = vsyncpa [#allocation3], 1 }
 0x120   :  { %446 = vsyncpa [#allocation3 + $0x1], 1 }
 0x121   :  { %447 = vsyncpa [#allocation6], 1 }
 0x122   :  { %448 = vsyncpa [#allocation4], 1 }
 0x123   :  { %450 = vsyncpa [#allocation4 + $0x1], 1 }

</bundles_post_ra>
